<compile_context>
chip_gen: v5e
topology: v5e:2x2
jax: 0.10.0
libtpu: 0.0.40
codegen_flags: <defaults>
</compile_context>

<pallas_src>
import functools

import jax
import jax.numpy as jnp
from jax.experimental import pallas as pl
from jax.experimental.pallas import tpu as pltpu


PACK = 4    # pixel rows packed per kernel row  -> LHS lanes = PACK*KPAD = 128 (dense)
KPAD = 32   # im2col K (= 3*3*3 = 27) zero-padded to 32


def _conv_bn_relu_kernel(p_ref, w_ref, shift_ref, o_ref):
    # p_ref:     (tm/PACK, PACK*KPAD)   packed bf16 im2col rows (lane-dense)
    # w_ref:     (PACK*KPAD, PACK*Cout) block-diagonal bf16 weights (BN scale folded in)
    # shift_ref: (1, PACK*Cout)         folded BN shift (f32)
    # o_ref:     (tm/PACK, PACK*Cout)   f32 output (lane-dense -> unmasked stores)
    acc = jnp.dot(p_ref[...], w_ref[...], preferred_element_type=jnp.float32)
    o_ref[...] = jnp.maximum(acc + shift_ref[...], 0.0).astype(o_ref.dtype)


@functools.partial(jax.jit, static_argnames=("tm",))
def client_resnet18x1_forward(x_nchw, w_oihw, scale, shift, *, tm=4096):
    """x_nchw: (N, 3, H, W) float32 -> (N, 64, H, W) float32."""
    N, Cin, H, W = x_nchw.shape
    Cout, _, KH, KW = w_oihw.shape
    K = KH * KW * Cin
    assert K <= KPAD

    # ---- glue: NCHW -> NHWC (bf16), pad=1, im2col patch extraction ------------------
    x_nhwc = jnp.transpose(x_nchw, (0, 2, 3, 1)).astype(jnp.bfloat16)
    xp = jnp.pad(x_nhwc, ((0, 0), (1, 1), (1, 1), (0, 0)))
    patches = jnp.concatenate(
        [xp[:, kh:kh + H, kw:kw + W, :] for kh in range(KH) for kw in range(KW)],
        axis=-1,
    )  # (N, H, W, K), last-dim order (kh, kw, ci)
    M = N * H * W
    patches = patches.reshape(M, K)

    # row tile: big for the HBM roofline, clamped so small problems keep >= 2 grid steps
    tm_eff = max(128, min(tm, pl.next_power_of_2(max(1, M // 2))))
    M_pad = pl.cdiv(M, tm_eff) * tm_eff

    # pad rows to the grid and K -> KPAD, then pack PACK pixel rows per kernel row
    patches = jnp.pad(patches, ((0, M_pad - M), (0, KPAD - K)))
    patches_packed = patches.reshape(M_pad // PACK, PACK * KPAD)

    # weights: (Cout, Cin, KH, KW) -> (K, Cout) matching patch order; fold BN scale;
    # replicate into a block-diagonal (PACK*KPAD, PACK*Cout) matrix so the packed matmul
    # emits PACK pixels side-by-side (lane-dense output, no in-kernel reshape needed).
    w_mat = jnp.transpose(w_oihw, (2, 3, 1, 0)).reshape(K, Cout)
    w_mat = w_mat * scale.reshape(1, Cout)
    w_pad = jnp.pad(w_mat, ((0, KPAD - K), (0, 0)))                    # (KPAD, Cout)
    eye = jnp.eye(PACK, dtype=w_pad.dtype)
    w_big = jnp.einsum("pq,ko->pkqo", eye, w_pad)
    w_big = w_big.reshape(PACK * KPAD, PACK * Cout).astype(jnp.bfloat16)

    shift_big = jnp.tile(shift.reshape(1, Cout), (1, PACK)).astype(jnp.float32)

    tm_rows = tm_eff // PACK
    grid = (M_pad // tm_eff,)

    out_packed = pl.pallas_call(
        _conv_bn_relu_kernel,
        out_shape=jax.ShapeDtypeStruct((M_pad // PACK, PACK * Cout), jnp.float32),
        grid_spec=pltpu.PrefetchScalarGridSpec(
            num_scalar_prefetch=0,
            grid=grid,
            in_specs=[
                pl.BlockSpec((tm_rows, PACK * KPAD), lambda i: (i, 0)),
                pl.BlockSpec((PACK * KPAD, PACK * Cout), lambda i: (0, 0)),
                pl.BlockSpec((1, PACK * Cout), lambda i: (0, 0)),
            ],
            out_specs=pl.BlockSpec((tm_rows, PACK * Cout), lambda i: (i, 0)),
        ),
        compiler_params=pltpu.CompilerParams(
            dimension_semantics=("parallel",),
            # allow XLA to fuse the pad/concat im2col producer into the patch operand
            allow_input_fusion=[True, False, False],
        ),
    )(patches_packed, w_big, shift_big)

    # (M_pad/PACK, PACK*Cout) f32 is row-major identical memory to (M_pad, Cout)
    out = out_packed.reshape(M_pad, Cout)[:M].reshape(N, H, W, Cout)
    return jnp.transpose(out, (0, 3, 1, 2))


def _reference_forward(x_nchw, w_oihw, scale, shift):
    y = jax.lax.conv_general_dilated(
        x_nchw, w_oihw,
        window_strides=(1, 1), padding="SAME",
        dimension_numbers=("NCHW", "OIHW", "NCHW"),
        precision=jax.lax.Precision.HIGHEST,
    )
    y = y * scale[None, :, None, None] + shift[None, :, None, None]
    return jnp.maximum(y, 0.0)


if __name__ == "__main__":
    key = jax.random.PRNGKey(0)
    k_x, k_w, k_g, k_b, k_m, k_v = jax.random.split(key, 6)

    N, Cin, H, W, Cout = 2, 3, 16, 16, 64

    # deterministic synthetic parameters (shapes from the module __init__)
    x = jax.random.normal(k_x, (N, Cin, H, W), dtype=jnp.float32)
    w_conv = 0.1 * jax.random.normal(k_w, (Cout, Cin, 3, 3), dtype=jnp.float32)

    gamma = jax.random.uniform(k_g, (Cout,), minval=0.5, maxval=1.5, dtype=jnp.float32)
    beta = 0.1 * jax.random.normal(k_b, (Cout,), dtype=jnp.float32)
    running_mean = 0.1 * jax.random.normal(k_m, (Cout,), dtype=jnp.float32)
    running_var = jax.random.uniform(k_v, (Cout,), minval=0.5, maxval=1.5, dtype=jnp.float32)
    eps = 1e-5

    # fold BN (eval mode) into per-channel scale/shift
    bn_scale = gamma / jnp.sqrt(running_var + eps)
    bn_shift = beta - running_mean * bn_scale

    out = client_resnet18x1_forward(x, w_conv, bn_scale, bn_shift)
    out = jax.block_until_ready(out)

    assert out.shape == (N, Cout, H, W), out.shape

    ref = jax.block_until_ready(_reference_forward(x, w_conv, bn_scale, bn_shift))
    max_err = float(jnp.max(jnp.abs(out - ref)))
    assert max_err < 5e-2, f"max abs error too large: {max_err}"

    print("KERNEL_OK")
</pallas_src>

<mosaic_0001>
module attributes {stable_mosaic.version = 11 : i64} {
  func.func @_conv_bn_relu_kernel(%arg0: i32, %arg1: memref<64x128xbf16, #tpu.memory_space<vmem>>, %arg2: memref<128x256xbf16, #tpu.memory_space<vmem>>, %arg3: memref<1x256xf32, #tpu.memory_space<vmem>>, %arg4: memref<64x256xf32, #tpu.memory_space<vmem>>) attributes {dimension_semantics = [#tpu.dimension_semantics<parallel>], iteration_bounds = array<i64: 2>, scalar_prefetch = 0 : i64, scratch_operands = 0 : i64, tpu.core_type = #tpu.core_type<tc>, window_params = [{transform_indices = @transform_0, window_bounds = array<i64: 64, 128>}, {pipeline_mode = #tpu.pipeline_mode<synchronous>, transform_indices = @transform_1, window_bounds = array<i64: 128, 256>}, {pipeline_mode = #tpu.pipeline_mode<synchronous>, transform_indices = @transform_2, window_bounds = array<i64: 1, 256>}, {transform_indices = @transform_3, window_bounds = array<i64: 64, 256>}]} {
    %c0 = arith.constant 0 : index
    %c0_0 = arith.constant 0 : index
    %0 = vector.load %arg1[%c0, %c0_0] : memref<64x128xbf16, #tpu.memory_space<vmem>>, vector<64x128xbf16>
    %c0_1 = arith.constant 0 : index
    %c0_2 = arith.constant 0 : index
    %1 = vector.load %arg2[%c0_1, %c0_2] : memref<128x256xbf16, #tpu.memory_space<vmem>>, vector<128x256xbf16>
    %cst = arith.constant dense<0.000000e+00> : vector<64x256xf32>
    %2 = tpu.matmul %0, %1, %cst {dimension_numbers = #tpu.dot_dimension_numbers<[1], [0], [0], [1], [0, 0, 1, 1], [], []>} : vector<64x128xbf16>, vector<128x256xbf16>, vector<64x256xf32> -> vector<64x256xf32>
    %c0_3 = arith.constant 0 : index
    %c0_4 = arith.constant 0 : index
    %3 = vector.load %arg3[%c0_3, %c0_4] : memref<1x256xf32, #tpu.memory_space<vmem>>, vector<1x256xf32>
    %4 = vector.broadcast %3 : vector<1x256xf32> to vector<64x256xf32>
    %5 = arith.addf %2, %4 : vector<64x256xf32>
    %cst_5 = arith.constant 0.000000e+00 : f32
    %6 = vector.broadcast %cst_5 : f32 to vector<64x256xf32>
    %7 = arith.maximumf %5, %6 : vector<64x256xf32>
    %c0_6 = arith.constant 0 : index
    %c0_7 = arith.constant 0 : index
    %8 = vector.load %arg4[%c0_6, %c0_7] : memref<64x256xf32, #tpu.memory_space<vmem>>, vector<64x256xf32>
    tpu.vector_store %arg4[%c0_6, %c0_7], %7 {strides = array<i32>} : memref<64x256xf32, #tpu.memory_space<vmem>>, vector<64x256xf32>,
    return
  }
  func.func @transform_0(%arg0: i32) -> (i32, i32) {
    %c0_i32 = arith.constant 0 : i32
    %c0_i32_0 = arith.constant 0 : i32
    return %arg0, %c0_i32 : i32, i32
  }
  func.func @transform_1(%arg0: i32) -> (i32, i32) {
    %c0_i32 = arith.constant 0 : i32
    %c0_i32_0 = arith.constant 0 : i32
    %c0_i32_1 = arith.constant 0 : i32
    return %c0_i32, %c0_i32_0 : i32, i32
  }
  func.func @transform_2(%arg0: i32) -> (i32, i32) {
    %c0_i32 = arith.constant 0 : i32
    %c0_i32_0 = arith.constant 0 : i32
    %c0_i32_1 = arith.constant 0 : i32
    return %c0_i32, %c0_i32_0 : i32, i32
  }
  func.func @transform_3(%arg0: i32) -> (i32, i32) {
    %c0_i32 = arith.constant 0 : i32
    %c0_i32_0 = arith.constant 0 : i32
    return %arg0, %c0_i32 : i32, i32
  }
}

</mosaic_0001>

<bundles_post_ra>
// kernel: client_resnet18x1_forward.1
= control target key start
LH: loop header
LB: loop body
LE: loop exit
PB: predicated region body
PF: predicated region fallthrough
CT: control target
= control target key end

     0   :  { %s623_s12 = smov 0   ;;  %s763_s0 = inlined_call_operand.vmem [shape: bf16[128,128], index: 0, kind: input, shape index: {}]   ;;  %s764_s1 = inlined_call_operand.vmem [shape: bf16[128,256], index: 1, kind: input, shape index: {}]   ;;  %s765_s2 = inlined_call_operand.vmem [shape: f32[1,256], index: 2, kind: input, shape index: {}]   ;;  %s766_s3 = inlined_call_operand.vmem [shape: f32[128,256], index: 3, kind: output, shape index: {}]  }
   0x1 LB: > { %s458_s13 = sadd.s32 4294967295, %s601_s12   ;;  %p462_p0 = scmp.ge.s32.totalorder %s601_s12, 1  ;;  %s601_s12 = sphi %s623_s12, %s13_s12  }
   0x2   : > { %p138_p1 = scmp.lt.s32.totalorder %s601_s12, 3 }
   0x4   : > { %p139_p2 = pnand %p462_p0, %p138_p1 }
   0x5   : > { %s463_s29 = sshll.u32 (!%p139_p2), %s458_s13, 3 }
   0x6   : > { %142 = sbr.rel (%p139_p2) target bundleno = 207 (0xcf), region = 32  ;;  %p164_p3 = scmp.lt.s32.totalorder (!%p139_p2), %s463_s29, 15 }
   0xb   : > { %v542_v0 = vld [vmem:[%s764_s1 + $0x70] sm:$0xf]  ;;  %v570_v1 = vld [vmem:[%s764_s1 + $0x74] sm:$0xf0]  ;;  %v569_v2 = vld [vmem:[%s764_s1 + $0x74] sm:$0xf] }
   0xc   : > { %v543_v3 = vor.u32 %v570_v1, %v542_v0  ;;  %v544_v4 = vld [vmem:[%s764_s1 + $0x78] sm:$0xf0]  ;;  %v534_v5 = vld [vmem:[%s764_s1 + $0x60] sm:$0xf]  ;;  %v568_v6 = vld [vmem:[%s764_s1 + $0x64] sm:$0xf0] }
   0xd   : > { %v547_v7 = vor.u32 %v569_v2, %v544_v4  ;;  %v567_v8 = vld [vmem:[%s764_s1 + $0x64] sm:$0xf]  ;;  %v536_v9 = vld [vmem:[%s764_s1 + $0x68] sm:$0xf0]  ;;  %v535_v10 = vor.u32 %v568_v6, %v534_v5  ;;  %v526_v12 = vld [vmem:[%s764_s1 + $0x50] sm:$0xf] }
   0xe   : > { %310 = vmatpush.bf16.msra.mxu0 %v543_v3  ;;  %571 = vmatpush.bf16.msra.mxu2 %v543_v3  ;;  %v539_v11 = vor.u32 %v567_v8, %v536_v9  ;;  %v566_v13 = vld [vmem:[%s764_s1 + $0x54] sm:$0xf0]  ;;  %v565_v14 = vld [vmem:[%s764_s1 + $0x54] sm:$0xf]  ;;  %v528_v15 = vld [vmem:[%s764_s1 + $0x58] sm:$0xf0] }
   0xf   : > { %339 = vmatpush.bf16.msra.mxu1 %v547_v7  ;;  %579 = vmatpush.bf16.msra.mxu3 %v547_v7  ;;  %v527_v16 = vor.u32 %v566_v13, %v526_v12  ;;  %v531_v17 = vor.u32 %v565_v14, %v528_v15  ;;  %v518_v18 = vld [vmem:[%s764_s1 + $0x40] sm:$0xf]  ;;  %v564_v19 = vld [vmem:[%s764_s1 + $0x44] sm:$0xf0]  ;;  %v563_v20 = vld [vmem:[%s764_s1 + $0x44] sm:$0xf] }
  0x10   : > { %v520_v21 = vld [vmem:[%s764_s1 + $0x48] sm:$0xf0]  ;;  %v519_v22 = vor.u32 %v564_v19, %v518_v18  ;;  %v510_v24 = vld [vmem:[%s764_s1 + $0x30] sm:$0xf]  ;;  %v562_v25 = vld [vmem:[%s764_s1 + $0x34] sm:$0xf0] }
  0x11   : > { %v523_v23 = vor.u32 %v563_v20, %v520_v21  ;;  %v561_v26 = vld [vmem:[%s764_s1 + $0x34] sm:$0xf]  ;;  %v512_v27 = vld [vmem:[%s764_s1 + $0x38] sm:$0xf0]  ;;  %v511_v28 = vor.u32 %v562_v25, %v510_v24  ;;  %v502_v30 = vld [vmem:[%s764_s1 + $0x20] sm:$0xf] }
  0x12   : > { %311 = vmatpush.bf16.msra.mxu0 %v535_v10  ;;  %572 = vmatpush.bf16.msra.mxu2 %v535_v10  ;;  %v515_v29 = vor.u32 %v561_v26, %v512_v27  ;;  %v560_v31 = vld [vmem:[%s764_s1 + $0x24] sm:$0xf0]  ;;  %v559_v32 = vld [vmem:[%s764_s1 + $0x24] sm:$0xf]  ;;  %v504_v33 = vld [vmem:[%s764_s1 + $0x28] sm:$0xf0] }
  0x13   : > { %340 = vmatpush.bf16.msra.mxu1 %v539_v11  ;;  %580 = vmatpush.bf16.msra.mxu3 %v539_v11  ;;  %v503_v34 = vor.u32 %v560_v31, %v502_v30  ;;  %v507_v35 = vor.u32 %v559_v32, %v504_v33  ;;  %v494_v36 = vld [vmem:[%s764_s1 + $0x10] sm:$0xf]  ;;  %v558_v37 = vld [vmem:[%s764_s1 + $0x14] sm:$0xf0]  ;;  %s768_s29 = smov (!%p164_p3, %s463_s29), 15 }
  0x14   : > { %v557_v38 = vld [vmem:[%s764_s1 + $0x14] sm:$0xf]  ;;  %v496_v39 = vld [vmem:[%s764_s1 + $0x18] sm:$0xf0]  ;;  %v495_v40 = vor.u32 %v558_v37, %v494_v36  ;;  %v486_v42 = vld [vmem:[%s764_s1] sm:$0xf] }
  0x15   : > { %v499_v41 = vor.u32 %v557_v38, %v496_v39  ;;  %v556_v43 = vld [vmem:[%s764_s1 + $0x4] sm:$0xf0]  ;;  %s464_s24 = sshll.u32 %s768_s29, 2  ;;  %v555_v44 = vld [vmem:[%s764_s1 + $0x4] sm:$0xf]  ;;  %s550_s8 = sshll.u32 %s768_s29, 4 }
  0x16   : > { %312 = vmatpush.bf16.msra.mxu0 %v527_v16  ;;  %573 = vmatpush.bf16.msra.mxu2 %v527_v16  ;;  %v488_v45 = vld [vmem:[%s764_s1 + $0x8] sm:$0xf0]  ;;  %v487_v46 = vor.u32 %v556_v43, %v486_v42  ;;  %s167_s5 = scalar_lea.vmem %s763_s0, %s464_s24  ;;  %v200_v52 = vld [vmem:[%s765_s2] sm:$0x3]  ;;  %s742_s10 = scalar_lea.vmem %s766_s3, %s550_s8 }
  0x17   : > { %341 = vmatpush.bf16.msra.mxu1 %v531_v17  ;;  %581 = vmatpush.bf16.msra.mxu3 %v531_v17  ;;  %v491_v47 = vor.u32 %v555_v44, %v488_v45  ;;  %v551_v48 = vld [vmem:[%s167_s5] sm:$0xff]  ;;  %v553_v49 = vld [vmem:[%s167_s5 + $0x10] sm:$0xff]  ;;  %v552_v50 = vld [vmem:[%s167_s5 + $0x8] sm:$0xff]  ;;  %v202_v53 = vperm.slane %v200_v52, 0  ;;  %v203_v54 = vperm.slane %v200_v52, 1 }
  0x18   : > { %v554_v51 = vld [vmem:[%s167_s5 + $0x18] sm:$0xff] }
  0x1a   : > { %313 = vmatpush.bf16.msra.mxu0 %v519_v22  ;;  %574 = vmatpush.bf16.msra.mxu2 %v519_v22 }
  0x1b   : > { %342 = vmatpush.bf16.msra.mxu1 %v523_v23  ;;  %582 = vmatpush.bf16.msra.mxu3 %v523_v23 }
  0x1e   : > { %314 = vmatpush.bf16.msra.mxu0 %v511_v28  ;;  %575 = vmatpush.bf16.msra.mxu2 %v511_v28 }
  0x1f   : > { %343 = vmatpush.bf16.msra.mxu1 %v515_v29  ;;  %583 = vmatpush.bf16.msra.mxu3 %v515_v29 }
  0x22   : > { %315 = vmatpush.bf16.msra.mxu0 %v503_v34  ;;  %576 = vmatpush.bf16.msra.mxu2 %v503_v34 }
  0x23   : > { %344 = vmatpush.bf16.msra.mxu1 %v507_v35  ;;  %584 = vmatpush.bf16.msra.mxu3 %v507_v35 }
  0x26   : > { %316 = vmatpush.bf16.msra.mxu0 %v495_v40  ;;  %577 = vmatpush.bf16.msra.mxu2 %v495_v40 }
  0x27   : > { %345 = vmatpush.bf16.msra.mxu1 %v499_v41  ;;  %585 = vmatpush.bf16.msra.mxu3 %v499_v41 }
  0x2a   : > { %317 = vmatpush.bf16.msra.mxu0 %v487_v46  ;;  %578 = vmatpush.bf16.msra.mxu2 %v487_v46 }
  0x2b   : > { %346 = vmatpush.bf16.msra.mxu1 %v491_v47  ;;  %586 = vmatpush.bf16.msra.mxu3 %v491_v47 }
  0x2d   : > { %318 = vmatmul.bf16.vlgmr.msra.gmra.mxu0 %v551_v48  ;;  %328 = vmatmul.bf16.vlgmr.msra.gmra.mxu2 %v553_v49 }
  0x2e   : > { %347 = vmatmul.bf16.vlgmr.msra.gmra.mxu1 %v551_v48  ;;  %357 = vmatmul.bf16.vlgmr.msra.gmra.mxu3 %v553_v49 }
  0x3d   : > { %323 = vmatmul.bf16.gmra.mxu0 %v552_v50  ;;  %333 = vmatmul.bf16.gmra.mxu2 %v554_v51 }
  0x3e   : > { %352 = vmatmul.bf16.gmra.mxu1 %v552_v50  ;;  %362 = vmatmul.bf16.gmra.mxu3 %v554_v51 }
  0xaa   : > { %v319_v55 = vpop.f32.mrf.mxu0 }
  0xab   : > { %v320_v56 = vadd.f32 %v319_v55, %v202_v53  ;;  %v348_v57 = vpop.f32.mrf.mxu1 }
  0xac   : > { %v349_v58 = vadd.f32 %v348_v57, %v203_v54 }
  0xad   : > { %v368_v59 = vmax.f32 %v320_v56, 0.0 }
  0xae   : > { %v369_v60 = vmax.f32 %v349_v58, 0.0 }
  0xaf   : > { %384 = vst [vmem:[%s742_s10] sm:$0xff] %v368_v59 }
  0xb0   : > { %385 = vst [vmem:[%s742_s10 + $0x8] sm:$0xff] %v369_v60  ;;  %v329_v61 = vpop.f32.mrf.mxu2 }
  0xb1   : > { %v330_v62 = vadd.f32 %v329_v61, %v202_v53  ;;  %v358_v63 = vpop.f32.mrf.mxu3 }
  0xb2   : > { %v359_v0 = vadd.f32 %v358_v63, %v203_v54  ;;  %v321_v1 = vpop.f32.mrf.mxu0 }
  0xb3   : > { %v376_v2 = vmax.f32 %v330_v62, 0.0  ;;  %v322_v3 = vadd.f32 %v321_v1, %v202_v53  ;;  %v350_v4 = vpop.f32.mrf.mxu1 }
  0xb4   : > { %v377_v5 = vmax.f32 %v359_v0, 0.0  ;;  %v351_v6 = vadd.f32 %v350_v4, %v203_v54 }
  0xb5   : > { %392 = vst [vmem:[%s742_s10 + $0x40] sm:$0xff] %v376_v2  ;;  %v370_v7 = vmax.f32 %v322_v3, 0.0 }
  0xb6   : > { %393 = vst [vmem:[%s742_s10 + $0x48] sm:$0xff] %v377_v5  ;;  %v371_v8 = vmax.f32 %v351_v6, 0.0 }
  0xb7   : > { %386 = vst [vmem:[%s742_s10 + $0x10] sm:$0xff] %v370_v7 }
  0xb8   : > { %387 = vst [vmem:[%s742_s10 + $0x18] sm:$0xff] %v371_v8  ;;  %v331_v9 = vpop.f32.mrf.mxu2 }
  0xb9   : > { %v332_v10 = vadd.f32 %v331_v9, %v202_v53  ;;  %v360_v11 = vpop.f32.mrf.mxu3 }
  0xba   : > { %v361_v12 = vadd.f32 %v360_v11, %v203_v54  ;;  %v324_v13 = vpop.f32.mrf.mxu0 }
  0xbb   : > { %v378_v14 = vmax.f32 %v332_v10, 0.0  ;;  %v325_v15 = vadd.f32 %v324_v13, %v202_v53  ;;  %v353_v16 = vpop.f32.mrf.mxu1 }
  0xbc   : > { %v379_v17 = vmax.f32 %v361_v12, 0.0  ;;  %v354_v18 = vadd.f32 %v353_v16, %v203_v54 }
  0xbd   : > { %394 = vst [vmem:[%s742_s10 + $0x50] sm:$0xff] %v378_v14  ;;  %v372_v19 = vmax.f32 %v325_v15, 0.0 }
  0xbe   : > { %395 = vst [vmem:[%s742_s10 + $0x58] sm:$0xff] %v379_v17  ;;  %v373_v20 = vmax.f32 %v354_v18, 0.0 }
  0xbf   : > { %388 = vst [vmem:[%s742_s10 + $0x20] sm:$0xff] %v372_v19 }
  0xc0   : > { %389 = vst [vmem:[%s742_s10 + $0x28] sm:$0xff] %v373_v20  ;;  %v334_v21 = vpop.f32.mrf.mxu2 }
  0xc1   : > { %v335_v22 = vadd.f32 %v334_v21, %v202_v53  ;;  %v363_v23 = vpop.f32.mrf.mxu3 }
  0xc2   : > { %v364_v24 = vadd.f32 %v363_v23, %v203_v54  ;;  %v326_v25 = vpop.f32.mrf.mxu0 }
  0xc3   : > { %v380_v26 = vmax.f32 %v335_v22, 0.0  ;;  %v327_v27 = vadd.f32 %v326_v25, %v202_v53  ;;  %v355_v28 = vpop.f32.mrf.mxu1 }
  0xc4   : > { %v381_v29 = vmax.f32 %v364_v24, 0.0  ;;  %v356_v30 = vadd.f32 %v355_v28, %v203_v54 }
  0xc5   : > { %396 = vst [vmem:[%s742_s10 + $0x60] sm:$0xff] %v380_v26  ;;  %v374_v31 = vmax.f32 %v327_v27, 0.0 }
  0xc6   : > { %397 = vst [vmem:[%s742_s10 + $0x68] sm:$0xff] %v381_v29  ;;  %v375_v32 = vmax.f32 %v356_v30, 0.0 }
  0xc7   : > { %390 = vst [vmem:[%s742_s10 + $0x30] sm:$0xff] %v374_v31 }
  0xc8   : > { %391 = vst [vmem:[%s742_s10 + $0x38] sm:$0xff] %v375_v32  ;;  %v336_v33 = vpop.f32.mrf.mxu2 }
  0xc9   : > { %v337_v34 = vadd.f32 %v336_v33, %v202_v53  ;;  %v365_v35 = vpop.f32.mrf.mxu3 }
  0xca   : > { %v366_v36 = vadd.f32 %v365_v35, %v203_v54 }
  0xcb   : > { %v382_v37 = vmax.f32 %v337_v34, 0.0 }
  0xcc   : > { %v383_v38 = vmax.f32 %v366_v36, 0.0 }
  0xcd   : > { %398 = vst [vmem:[%s742_s10 + $0x70] sm:$0xff] %v382_v37 }
  0xce   : > { %399 = vst [vmem:[%s742_s10 + $0x78] sm:$0xff] %v383_v38 }
  0xcf PF: > { %s13_s12 = sadd.s32 1, %s601_s12  }
  0xd0   : > { %p10_p4 = scmp.ge.s32.totalorder %s13_s12, 4  }
  0xd2   :  { %12 = sbr.rel (!%p10_p4) target bundleno = 1 (0x1), region = 62 }

</bundles_post_ra>
